<compile_context>
chip_gen: v6e
topology: v6e:2x2x1
jax: 0.10.0
libtpu: 0.0.40
codegen_flags: <defaults>
</compile_context>

<pallas_src>
import functools
import math

import jax
import jax.numpy as jnp
from jax.experimental import pallas as pl
from jax.experimental.pallas import tpu as pltpu


# ---------------------------------------------------------------------------
# Helpers
# ---------------------------------------------------------------------------
def _round_up(x, m):
    return (x + m - 1) // m * m


def _sublane(dtype):
    # Packed sub-32-bit dtypes need proportionally more sublanes per tile.
    return max(8, 32 // jnp.dtype(dtype).itemsize)   # f32 -> 8, bf16 -> 16, i8 -> 32


def _vmem_capacity_bytes():
    try:
        return int(pltpu.get_tpu_info().vmem_capacity_bytes)
    except Exception:
        return 64 * 1024 * 1024   # conservative (v7x per-TensorCore)


def _pick_tile_pad(dim, target, align):
    """Return (tile, padded_dim). tile is a multiple of `align`.

    Prefer a divisor of the align-rounded dim when it is not much smaller than
    the target; otherwise pad the dim up to a multiple of the target tile
    (never collapse the tile to a tiny divisor)."""
    dim_a = _round_up(max(dim, align), align)
    t = _round_up(min(target, dim_a), align)
    d = t
    while d >= align and dim_a % d:
        d -= align
    if d >= max(align, t // 2):
        return d, dim_a
    return t, _round_up(dim_a, t)


# ---------------------------------------------------------------------------
# Kernels
# ---------------------------------------------------------------------------
def _linear_kernel_resident(x_ref, w_ref, b_ref, o_ref, *, precision):
    # Whole (Kp, Np) weight resident in VMEM; one (tm, Np) output tile per step.
    acc = jnp.dot(x_ref[...], w_ref[...],
                  preferred_element_type=jnp.float32, precision=precision)
    o_ref[...] = (acc + b_ref[...]).astype(o_ref.dtype)


def _linear_kernel_tiled(x_ref, w_ref, b_ref, o_ref, acc_ref, *, precision):
    k = pl.program_id(2)
    part = jnp.dot(x_ref[...], w_ref[...],
                   preferred_element_type=jnp.float32, precision=precision)

    @pl.when(k == 0)
    def _():                       # assign (no zero-fill + add)
        acc_ref[...] = part

    @pl.when(k > 0)
    def _():
        acc_ref[...] += part

    @pl.when(k == pl.num_programs(2) - 1)
    def _():
        o_ref[...] = (acc_ref[...] + b_ref[...]).astype(o_ref.dtype)


# ---------------------------------------------------------------------------
# Weight pre-layout (cacheable across calls)
# ---------------------------------------------------------------------------
def prepare_linear_norm_params(weight, bias=None, *, mxu_dtype=jnp.bfloat16):
    """weight (out_dim, in_dim) -> (Kp, Np) transposed/padded MXU-dtype array,
    bias -> (1, Np) f32.  Compute once and pass via `prepared=` to avoid the
    per-call transpose/pad/cast HBM round trip."""
    out_dim, in_dim = weight.shape
    Kp = _round_up(in_dim, 128)
    Np = _round_up(out_dim, 128)
    wt = jnp.transpose(weight).astype(mxu_dtype)
    if (Kp, Np) != (in_dim, out_dim):
        wt = jnp.pad(wt, ((0, Kp - in_dim), (0, Np - out_dim)))
    if bias is None:
        b = jnp.zeros((1, Np), jnp.float32)
    else:
        b = bias.astype(jnp.float32).reshape(1, out_dim)
        if Np != out_dim:
            b = jnp.pad(b, ((0, 0), (0, Np - out_dim)))
    return wt, b


# ---------------------------------------------------------------------------
# Forward wrapper
# ---------------------------------------------------------------------------
def linear_norm_forward(x, weight, bias=None, *,
                        mxu_dtype=jnp.bfloat16,       # bf16 MXU inputs, f32 accumulate
                        precision=None,               # set lax.Precision.HIGHEST for strict f32
                        prepared=None,                # output of prepare_linear_norm_params
                        force_tiled=False,
                        tile_m=None, tile_n=None, tile_k=None):
    """y = x @ weight.T + bias  (weight in PyTorch (out_dim, in_dim) layout)."""
    orig_dtype = x.dtype
    out_dim, in_dim = weight.shape
    lead = x.shape[:-1]
    M = 1
    for d in lead:
        M *= int(d)

    sub = max(_sublane(mxu_dtype), _sublane(orig_dtype))
    itemsize = jnp.dtype(mxu_dtype).itemsize
    out_itemsize = jnp.dtype(orig_dtype).itemsize
    cap = _vmem_capacity_bytes()
    budget = int(0.55 * cap)

    if prepared is None:
        prepared = prepare_linear_norm_params(weight, bias, mxu_dtype=mxu_dtype)
    w_p, b_p = prepared
    Kp, Np = w_p.shape

    x2 = x.reshape(M, in_dim).astype(mxu_dtype)

    w_bytes = Kp * Np * itemsize
    # minimal weight-resident footprint (double-buffered blocks)
    min_need = 2 * w_bytes + 2 * sub * Kp * itemsize + 2 * sub * Np * out_itemsize
    use_resident = (not force_tiled) and (min_need <= budget)

    if use_resident:
        # -------- Path A: weight-resident, grid over M only ------------------
        tm = _round_up(min(512, max(M, sub)), sub)
        while tm > sub:
            need = (2 * w_bytes + 2 * tm * Kp * itemsize
                    + 2 * tm * Np * out_itemsize + 2 * Np * 4)
            if need <= budget:
                break
            tm = max(sub, _round_up(tm // 2, sub))
        need = (2 * w_bytes + 2 * tm * Kp * itemsize
                + 2 * tm * Np * out_itemsize + 2 * Np * 4)
        Mp = _round_up(max(M, tm), tm)

        if (Mp, Kp) != (M, in_dim):
            x_p = jnp.zeros((Mp, Kp), mxu_dtype).at[:M, :in_dim].set(x2)
        else:
            x_p = x2

        kernel = functools.partial(_linear_kernel_resident, precision=precision)
        flops = 2 * Mp * Np * Kp
        bytes_accessed = (Mp * Kp * itemsize + Kp * Np * itemsize
                          + Np * 4 + Mp * Np * out_itemsize)

        out_padded = pl.pallas_call(
            kernel,
            out_shape=jax.ShapeDtypeStruct((Mp, Np), orig_dtype),
            grid_spec=pltpu.PrefetchScalarGridSpec(
                num_scalar_prefetch=0,
                grid=(Mp // tm,),
                in_specs=[
                    pl.BlockSpec((tm, Kp), lambda i: (i, 0)),    # x tile (streams)
                    pl.BlockSpec((Kp, Np), lambda i: (0, 0)),    # weight (resident)
                    pl.BlockSpec((1, Np), lambda i: (0, 0)),     # bias   (resident)
                ],
                out_specs=pl.BlockSpec((tm, Np), lambda i: (i, 0)),
            ),
            compiler_params=pltpu.CompilerParams(
                dimension_semantics=("parallel",),
                vmem_limit_bytes=int(min(cap, max(32 << 20, need + (8 << 20)))),
            ),
            cost_estimate=pl.CostEstimate(flops=flops, transcendentals=0,
                                          bytes_accessed=bytes_accessed),
        )(x_p, w_p, b_p)
    else:
        # -------- Path B: general tiled accumulator matmul (K last) ----------
        tm, Mp = _pick_tile_pad(M, tile_m or 256, sub)
        tn, Np2 = _pick_tile_pad(out_dim, tile_n or 512, 128)
        tk, Kp2 = _pick_tile_pad(in_dim, tile_k or 512, 128)

        if (Kp2, Np2) != (Kp, Np):      # re-pad prepared weight to tile multiples
            w_p = jnp.pad(w_p, ((0, Kp2 - Kp), (0, Np2 - Np)))
            b_p = jnp.pad(b_p, ((0, 0), (0, Np2 - Np)))
        Kp, Np = Kp2, Np2

        if (Mp, Kp) != (M, in_dim):
            x_p = jnp.zeros((Mp, Kp), mxu_dtype).at[:M, :in_dim].set(x2)
        else:
            x_p = x2

        grid = (Mp // tm, Np // tn, Kp // tk)
        kernel = functools.partial(_linear_kernel_tiled, precision=precision)

        need = (2 * tm * tk * itemsize + 2 * tk * tn * itemsize
                + 2 * tm * tn * out_itemsize + 2 * tn * 4 + tm * tn * 4)
        flops = 2 * Mp * Np * Kp
        bytes_accessed = (grid[1] * Mp * Kp * itemsize    # x re-read per N tile
                          + grid[0] * Kp * Np * itemsize  # w re-read per M tile
                          + Np * 4 + Mp * Np * out_itemsize)

        out_padded = pl.pallas_call(
            kernel,
            out_shape=jax.ShapeDtypeStruct((Mp, Np), orig_dtype),
            grid_spec=pltpu.PrefetchScalarGridSpec(
                num_scalar_prefetch=0,
                grid=grid,
                in_specs=[
                    pl.BlockSpec((tm, tk), lambda i, j, k: (i, k)),
                    pl.BlockSpec((tk, tn), lambda i, j, k: (k, j)),
                    pl.BlockSpec((1, tn), lambda i, j, k: (0, j)),
                ],
                out_specs=pl.BlockSpec((tm, tn), lambda i, j, k: (i, j)),
                scratch_shapes=[pltpu.VMEM((tm, tn), jnp.float32)],
            ),
            compiler_params=pltpu.CompilerParams(
                dimension_semantics=("parallel", "parallel", "arbitrary"),
                vmem_limit_bytes=int(min(cap, max(32 << 20, need + (8 << 20)))),
            ),
            cost_estimate=pl.CostEstimate(flops=flops, transcendentals=0,
                                          bytes_accessed=bytes_accessed),
        )(x_p, w_p, b_p)

    y = out_padded
    if (y.shape[0], y.shape[1]) != (M, out_dim):
        y = y[:M, :out_dim]
    return y.reshape(*lead, out_dim)


# ---------------------------------------------------------------------------
# Parameter init (matches LinearNorm: xavier_uniform_ weight, default bias init)
# ---------------------------------------------------------------------------
def init_linear_norm_params(key, in_dim, out_dim, w_init_gain="linear"):
    gain = 1.0  # torch.nn.init.calculate_gain('linear') == 1.0
    k_w, k_b = jax.random.split(key)
    w_bound = gain * math.sqrt(6.0 / (in_dim + out_dim))
    weight = jax.random.uniform(k_w, (out_dim, in_dim), jnp.float32, -w_bound, w_bound)
    b_bound = 1.0 / math.sqrt(in_dim)
    bias = jax.random.uniform(k_b, (out_dim,), jnp.float32, -b_bound, b_bound)
    return {"weight": weight, "bias": bias}


if __name__ == "__main__":
    key = jax.random.PRNGKey(0)
    k_x, k_p, k_x2, k_p2 = jax.random.split(key, 4)

    # ---- test 1: default bf16 MXU path, weight-resident kernel ---------------
    B, T, in_dim, out_dim = 2, 16, 256, 384
    x = jax.random.normal(k_x, (B, T, in_dim), jnp.float32)
    params = init_linear_norm_params(k_p, in_dim, out_dim)
    ref = (jnp.dot(x.reshape(-1, in_dim), params["weight"].T,
                   precision=jax.lax.Precision.HIGHEST).reshape(B, T, out_dim)
           + params["bias"])

    out = linear_norm_forward(x, params["weight"], params["bias"])
    out = jax.block_until_ready(out)
    assert out.shape == (B, T, out_dim), out.shape
    assert bool(jnp.all(jnp.isfinite(out)))
    # bf16 MXU inputs with f32 accumulation -> documented ~1e-2-level tolerance
    assert bool(jnp.allclose(out, ref, atol=3e-2, rtol=3e-2))

    # ---- test 2: f32 MXU path + non-aligned dims (exercises padding) ---------
    B2, T2, in2, out2 = 2, 8, 40, 48
    x2 = jax.random.normal(k_x2, (B2, T2, in2), jnp.float32)
    params2 = init_linear_norm_params(k_p2, in2, out2)
    ref2 = (jnp.dot(x2.reshape(-1, in2), params2["weight"].T,
                    precision=jax.lax.Precision.HIGHEST).reshape(B2, T2, out2)
            + params2["bias"])

    out2_ = linear_norm_forward(x2, params2["weight"], params2["bias"],
                                mxu_dtype=jnp.float32)
    out2_ = jax.block_until_ready(out2_)
    assert out2_.shape == (B2, T2, out2), out2_.shape
    assert bool(jnp.all(jnp.isfinite(out2_)))
    assert bool(jnp.allclose(out2_, ref2, atol=2e-2, rtol=2e-2))

    # ---- test 3: force the general tiled kernel (multi-step K reduction) -----
    out3 = linear_norm_forward(x, params["weight"], params["bias"],
                               force_tiled=True, tile_m=16, tile_n=128, tile_k=128)
    out3 = jax.block_until_ready(out3)
    assert out3.shape == (B, T, out_dim)
    assert bool(jnp.all(jnp.isfinite(out3)))
    assert bool(jnp.allclose(out3, ref, atol=3e-2, rtol=3e-2))

    # ---- test 4: pre-laid-out (cached) weight reuse ---------------------------
    prepared = prepare_linear_norm_params(params["weight"], params["bias"])
    out4 = linear_norm_forward(x, params["weight"], params["bias"], prepared=prepared)
    out4 = jax.block_until_ready(out4)
    assert bool(jnp.allclose(out4, out))

    print("KERNEL_OK")
</pallas_src>

<mosaic_0001>
module attributes {stable_mosaic.version = 11 : i64} {
  func.func @_linear_kernel_resident(%arg0: i32, %arg1: memref<32x256xbf16, #tpu.memory_space<vmem>>, %arg2: memref<256x384xbf16, #tpu.memory_space<vmem>>, %arg3: memref<1x384xf32, #tpu.memory_space<vmem>>, %arg4: memref<32x384xf32, #tpu.memory_space<vmem>>) attributes {dimension_semantics = [#tpu.dimension_semantics<parallel>], iteration_bounds = array<i64: 1>, scalar_prefetch = 0 : i64, scratch_operands = 0 : i64, tpu.core_type = #tpu.core_type<tc>, window_params = [{transform_indices = @transform_0, window_bounds = array<i64: 32, 256>}, {pipeline_mode = #tpu.pipeline_mode<synchronous>, transform_indices = @transform_1, window_bounds = array<i64: 256, 384>}, {pipeline_mode = #tpu.pipeline_mode<synchronous>, transform_indices = @transform_2, window_bounds = array<i64: 1, 384>}, {transform_indices = @transform_3, window_bounds = array<i64: 32, 384>}]} {
    %c0 = arith.constant 0 : index
    %c0_0 = arith.constant 0 : index
    %0 = vector.load %arg1[%c0, %c0_0] : memref<32x256xbf16, #tpu.memory_space<vmem>>, vector<32x256xbf16>
    %c0_1 = arith.constant 0 : index
    %c0_2 = arith.constant 0 : index
    %1 = vector.load %arg2[%c0_1, %c0_2] : memref<256x384xbf16, #tpu.memory_space<vmem>>, vector<256x384xbf16>
    %cst = arith.constant dense<0.000000e+00> : vector<32x384xf32>
    %2 = tpu.matmul %0, %1, %cst {dimension_numbers = #tpu.dot_dimension_numbers<[1], [0], [0], [1], [0, 0, 1, 1], [], []>} : vector<32x256xbf16>, vector<256x384xbf16>, vector<32x384xf32> -> vector<32x384xf32>
    %c0_3 = arith.constant 0 : index
    %c0_4 = arith.constant 0 : index
    %3 = vector.load %arg3[%c0_3, %c0_4] : memref<1x384xf32, #tpu.memory_space<vmem>>, vector<1x384xf32>
    %4 = vector.broadcast %3 : vector<1x384xf32> to vector<32x384xf32>
    %5 = arith.addf %2, %4 : vector<32x384xf32>
    %c0_5 = arith.constant 0 : index
    %c0_6 = arith.constant 0 : index
    %6 = vector.load %arg4[%c0_5, %c0_6] : memref<32x384xf32, #tpu.memory_space<vmem>>, vector<32x384xf32>
    tpu.vector_store %arg4[%c0_5, %c0_6], %5 {strides = array<i32>} : memref<32x384xf32, #tpu.memory_space<vmem>>, vector<32x384xf32>,
    return
  }
  func.func @transform_0(%arg0: i32) -> (i32, i32) {
    %c0_i32 = arith.constant 0 : i32
    %c0_i32_0 = arith.constant 0 : i32
    return %arg0, %c0_i32 : i32, i32
  }
  func.func @transform_1(%arg0: i32) -> (i32, i32) {
    %c0_i32 = arith.constant 0 : i32
    %c0_i32_0 = arith.constant 0 : i32
    %c0_i32_1 = arith.constant 0 : i32
    return %c0_i32, %c0_i32_0 : i32, i32
  }
  func.func @transform_2(%arg0: i32) -> (i32, i32) {
    %c0_i32 = arith.constant 0 : i32
    %c0_i32_0 = arith.constant 0 : i32
    %c0_i32_1 = arith.constant 0 : i32
    return %c0_i32, %c0_i32_0 : i32, i32
  }
  func.func @transform_3(%arg0: i32) -> (i32, i32) {
    %c0_i32 = arith.constant 0 : i32
    %c0_i32_0 = arith.constant 0 : i32
    return %arg0, %c0_i32 : i32, i32
  }
}

</mosaic_0001>

<bundles_post_ra>
// kernel: tpu_custom_call.1
= control target key start
LH: loop header
LB: loop body
LE: loop exit
PB: predicated region body
PF: predicated region fallthrough
CT: control target
= control target key end

     0   :  { %8 = vsyncpa [#allocation3], 0  ;;  %s803_s0 = inlined_call_operand.hbm [shape: bf16[32,256], index: 0, kind: input, shape index: {}]   ;;  %s804_s1 = inlined_call_operand.hbm [shape: bf16[256,384], index: 1, kind: input, shape index: {}]   ;;  %s805_s2 = inlined_call_operand.vmem [shape: f32[1,384], index: 2, kind: input, shape index: {}]   ;;  %s806_s3 = inlined_call_operand.hbm [shape: f32[32,384], index: 3, kind: output, shape index: {}]  }
   0x1   :  { %9 = vsyncpa [#allocation6], 0 }
   0x2   :  { %10 = vsyncpa [#allocation4], 0  ;;  %s762_s12 = smov [#allocation2]  }
   0x3   :  { %s16_s13 = sshll.u32 %s762_s12, 4  ;;  %s17_s13 = int_to_ptr.vmem [resolvable:$true] %s16_s13 }
   0x4   :  { %s704_s14 = scalar_lea.vmem %s17_s13, 512  ;;  %p709_p1 = scmp.lt.s32.totalorder %s17_s13, %s17_s13 }
   0x5   :  { %p705_p0 = scmp.ne.s32.totalorder %s17_s13, %s704_s14  ;;  %p710_p2 = scmp.lt.s32.totalorder %s704_s14, %s704_s14 }
   0x7   :  { %p711_p3 = por %p710_p2, %p709_p1 }
   0x9   :  { %p712_p4 = pnand %p711_p3, %p705_p0 }
   0xb   :  { %715 = shalt.err (!%p712_p4)
}
   0xc   :  { %s763_s15 = smov 128   ;;  %s764_s16 = smov 8  }
   0xd   :  { %22 = dma.hbm_to_vmem [thread:$0]  %s803_s0, 512, %s17_s13, [#allocation3], %s763_s15, %s763_s15, %s764_s16  }
   0xe   :  { %s765_s19 = smov [#allocation5]  }
   0xf   :  { %s28_s20 = sshll.u32 %s765_s19, 4  ;;  %s29_s20 = int_to_ptr.vmem [resolvable:$true] %s28_s20 }
  0x10   :  { %s724_s21 = scalar_lea.vmem %s29_s20, 6144  ;;  %p729_p6 = scmp.lt.s32.totalorder %s29_s20, %s29_s20 }
  0x11   :  { %p725_p5 = scmp.ne.s32.totalorder %s29_s20, %s724_s21  ;;  %p730_p7 = scmp.lt.s32.totalorder %s724_s21, %s724_s21 }
  0x13   :  { %p731_p8 = por %p730_p7, %p729_p6 }
  0x15   :  { %p732_p9 = pnand %p731_p8, %p725_p5 }
  0x17   :  { %735 = shalt.err (!%p732_p9)
}
  0x18   :  { %s766_s22 = smov 192   ;;  %s767_s23 = smov 12  }
  0x19   :  { %34 = dma.hbm_to_vmem [thread:$0]  %s804_s1, 6144, %s29_s20, [#allocation6], %s766_s22, %s766_s22, %s767_s23  }
  0x1a   :  { %756 = dma.done.wait [#allocation3], 512  }
  0x1b   :  { %757 = vsyncadd [#allocation3], 4294966784 }
  0x1c   :  { %758 = dma.done.wait [#allocation6], 6144  }
  0x1d   :  { %759 = vsyncadd [#allocation6], 4294961152  ;;  %v626_v0 = vld [vmem:[#allocation5 + $0xac] ss:$12 sps:$4 sm:$0xff]   ;;  %v628_v1 = vld [vmem:[#allocation5 + $0xa8] ss:$12 sps:$4 sm:$0xff]   ;;  %v114_v52 = vlaneseq }
  0x1e   :  { %405 = vmatprep.subr.bf16.mxu0 %v626_v0  ;;  %v629_v2 = vld [vmem:[#allocation5 + $0x94] ss:$12 sps:$4 sm:$0xff]   ;;  %v631_v3 = vld [vmem:[#allocation5 + $0x90] ss:$12 sps:$4 sm:$0xff]   ;;  %v634_v5 = vld [vmem:[#allocation5 + $0x78] ss:$12 sps:$4 sm:$0xff]  }
  0x1f   :  { %406 = vmatpush1.bf16.msra.mxu0 %v628_v1  ;;  %v632_v4 = vld [vmem:[#allocation5 + $0x7c] ss:$12 sps:$4 sm:$0xff]   ;;  %v635_v6 = vld [vmem:[#allocation5 + $0x64] ss:$12 sps:$4 sm:$0xff]   ;;  %v637_v8 = vld [vmem:[#allocation5 + $0x60] ss:$12 sps:$4 sm:$0xff]  }
  0x20   :  { %407 = vmatprep.subr.bf16.mxu0 %v629_v2  ;;  %v646_v7 = vld [vmem:[#allocation5 + $0x170] ss:$12 sps:$4 sm:$0xff]   ;;  %v638_v10 = vld [vmem:[#allocation5 + $0x4c] ss:$12 sps:$4 sm:$0xff]   ;;  %v640_v13 = vld [vmem:[#allocation5 + $0x48] ss:$12 sps:$4 sm:$0xff]  }
  0x21   :  { %589 = vmatprep.subr.bf16.mxu1 %v646_v7  ;;  %v648_v9 = vld [vmem:[#allocation5 + $0xb0] ss:$12 sps:$4 sm:$0xff]   ;;  %v651_v11 = vld [vmem:[#allocation5 + $0x158] ss:$12 sps:$4 sm:$0xff]   ;;  %v641_v14 = vld [vmem:[#allocation5 + $0x34] ss:$12 sps:$4 sm:$0xff]  }
  0x22   :  { %590 = vmatpush3.bf16.msra.mxu1 %v648_v9  ;;  %v653_v12 = vld [vmem:[#allocation5 + $0x98] ss:$12 sps:$4 sm:$0xff]   ;;  %v656_v15 = vld [vmem:[#allocation5 + $0x140] ss:$12 sps:$4 sm:$0xff]   ;;  %v643_v17 = vld [vmem:[#allocation5 + $0x30] ss:$12 sps:$4 sm:$0xff]  }
  0x23   :  { %408 = vmatpush1.bf16.msra.mxu0 %v631_v3  ;;  %591 = vmatprep.subr.bf16.mxu1 %v651_v11  ;;  %v658_v16 = vld [vmem:[#allocation5 + $0x80] ss:$12 sps:$4 sm:$0xff]   ;;  %v661_v18 = vld [vmem:[#allocation5 + $0x128] ss:$12 sps:$4 sm:$0xff]   ;;  %v647_v21 = vld [vmem:[#allocation5 + $0x18] ss:$12 sps:$4 sm:$0xff]  }
  0x24   :  { %409 = vmatprep.subr.bf16.mxu0 %v632_v4  ;;  %v644_v19 = vld [vmem:[#allocation5 + $0x1c] ss:$12 sps:$4 sm:$0xff]   ;;  %v649_v23 = vld [vmem:[#allocation5 + $0x4] ss:$12 sps:$4 sm:$0xff]   ;;  %v652_v26 = vld [vmem:[#allocation5] ss:$12 sps:$4 sm:$0xff]  }
  0x25   :  { %v663_v20 = vld [vmem:[#allocation5 + $0x68] ss:$12 sps:$4 sm:$0xff]   ;;  %v666_v22 = vld [vmem:[#allocation5 + $0x110] ss:$12 sps:$4 sm:$0xff]   ;;  %v671_v25 = vld [vmem:[#allocation5 + $0xf8] ss:$12 sps:$4 sm:$0xff]  }
  0x26   :  { %592 = vmatpush3.bf16.msra.mxu1 %v653_v12  ;;  %v668_v24 = vld [vmem:[#allocation5 + $0x50] ss:$12 sps:$4 sm:$0xff]   ;;  %v654_v27 = vld [vmem:[#allocation5 + $0x16c] ss:$12 sps:$4 sm:$0xff]   ;;  %v657_v30 = vld [vmem:[#allocation5 + $0x168] ss:$12 sps:$4 sm:$0xff]  }
  0x27   :  { %410 = vmatpush1.bf16.msra.mxu0 %v634_v5  ;;  %593 = vmatprep.subr.bf16.mxu1 %v656_v15  ;;  %v673_v28 = vld [vmem:[#allocation5 + $0x38] ss:$12 sps:$4 sm:$0xff]   ;;  %v676_v29 = vld [vmem:[#allocation5 + $0xe0] ss:$12 sps:$4 sm:$0xff]   ;;  %v681_v33 = vld [vmem:[#allocation5 + $0xc8] ss:$12 sps:$4 sm:$0xff]  }
  0x28   :  { %411 = vmatprep.subr.bf16.mxu0 %v635_v6  ;;  %v659_v31 = vld [vmem:[#allocation5 + $0x154] ss:$12 sps:$4 sm:$0xff]   ;;  %v662_v34 = vld [vmem:[#allocation5 + $0x150] ss:$12 sps:$4 sm:$0xff]   ;;  %v686_v35 = vld [vmem:[#allocation2 + $0x4] ss:$8 sps:$4 sm:$0xff]  }
  0x29   :  { %v678_v32 = vld [vmem:[#allocation5 + $0x20] ss:$12 sps:$4 sm:$0xff]   ;;  %v664_v36 = vld [vmem:[#allocation5 + $0x13c] ss:$12 sps:$4 sm:$0xff]   ;;  %490 = vmatprep.mubr.bf16.mxu1 %v686_v35  ;;  %437 = vmatprep.mubr.bf16.mxu0 %v686_v35  ;;  %v667_v38 = vld [vmem:[#allocation5 + $0x138] ss:$12 sps:$4 sm:$0xff]  }
  0x2a   :  { %594 = vmatpush3.bf16.msra.mxu1 %v658_v16  ;;  %v683_v37 = vld [vmem:[#allocation5 + $0x8] ss:$12 sps:$4 sm:$0xff]   ;;  %v669_v39 = vld [vmem:[#allocation5 + $0x124] ss:$12 sps:$4 sm:$0xff]   ;;  %v672_v42 = vld [vmem:[#allocation5 + $0x120] ss:$12 sps:$4 sm:$0xff]  }
  0x2b   :  { %412 = vmatpush1.bf16.msra.mxu0 %v637_v8  ;;  %595 = vmatprep.subr.bf16.mxu1 %v661_v18  ;;  %v684_v40 = vld [vmem:[#allocation2] ss:$8 sps:$4 sm:$0xff]   ;;  %v693_v41 = vld [vmem:[#allocation2 + $0x14] ss:$8 sps:$4 sm:$0xff]   ;;  %v674_v43 = vld [vmem:[#allocation5 + $0x10c] ss:$12 sps:$4 sm:$0xff]  }
  0x2c   :  { %413 = vmatprep.subr.bf16.mxu0 %v638_v10  ;;  %v677_v44 = vld [vmem:[#allocation5 + $0x108] ss:$12 sps:$4 sm:$0xff]   ;;  %v695_v46 = vld [vmem:[#allocation2 + $0x10] ss:$8 sps:$4 sm:$0xff]   ;;  %v692_v51 = vld [vmem:[#allocation5 + $0xc0] ss:$12 sps:$4 sm:$0xff]  }
  0x2d   :  { %v679_v45 = vld [vmem:[#allocation5 + $0xf4] ss:$12 sps:$4 sm:$0xff]   ;;  %v682_v47 = vld [vmem:[#allocation5 + $0xf0] ss:$12 sps:$4 sm:$0xff]   ;;  %v689_v49 = vld [vmem:[#allocation5 + $0xd8] ss:$12 sps:$4 sm:$0xff]  }
  0x2e   :  { %596 = vmatpush3.bf16.msra.mxu1 %v663_v20  ;;  %v687_v48 = vld [vmem:[#allocation5 + $0xdc] ss:$12 sps:$4 sm:$0xff]   ;;  %v690_v50 = vld [vmem:[#allocation5 + $0xc4] ss:$12 sps:$4 sm:$0xff]   ;;  %v115_v53 = vshrl.u32 %v114_v52, 7 }
  0x2f   :  { %414 = vmatpush1.bf16.msra.mxu0 %v640_v13  ;;  %597 = vmatprep.subr.bf16.mxu1 %v666_v22  ;;  %v112_v55 = vld [vmem:[%s805_s2] sm:$0x7]  ;;  %s768_s2 = smov [#allocation7]  }
  0x30   :  { %415 = vmatprep.subr.bf16.mxu0 %v641_v14  ;;  %v124_v54 = vsub.s32 2, %v115_v53  ;;  %v116_v7 = vsub.s32 0, %v115_v53  ;;  %v120_v9 = vsub.s32 1, %v115_v53  ;;  %s524_s26 = sshll.u32 %s768_s2, 4  ;;  %s525_s26 = int_to_ptr.vmem [resolvable:$true] %s524_s26 }
  0x31   :  { %s736_s27 = scalar_lea.vmem %s525_s26, 1536  ;;  %p741_p11 = scmp.lt.s32.totalorder %s525_s26, %s525_s26 }
  0x32   :  { %598 = vmatpush3.bf16.msra.mxu1 %v668_v24  ;;  %v125_v57 = vrot.slane %v112_v55, %v124_v54  ;;  %v117_v11 = vrot.slane %v112_v55, %v116_v7  ;;  %v121_v12 = vrot.slane %v112_v55, %v120_v9  ;;  %p737_p10 = scmp.ne.s32.totalorder %s525_s26, %s736_s27  ;;  %p742_p12 = scmp.lt.s32.totalorder %s736_s27, %s736_s27 }
  0x33   :  { %416 = vmatpush1.bf16.msra.mxu0 %v643_v17  ;;  %599 = vmatprep.subr.bf16.mxu1 %v671_v25 }
  0x34   :  { %417 = vmatprep.subr.bf16.mxu0 %v644_v19  ;;  %p743_p13 = por %p742_p12, %p741_p11 }
  0x36   :  { %600 = vmatpush3.bf16.msra.mxu1 %v673_v28  ;;  %p744_p0 = pnand %p743_p13, %p737_p10 }
  0x37   :  { %418 = vmatpush1.bf16.msra.mxu0 %v647_v21  ;;  %601 = vmatprep.subr.bf16.mxu1 %v676_v29 }
  0x38   :  { %419 = vmatprep.subr.bf16.mxu0 %v649_v23 }
  0x3a   :  { %602 = vmatpush3.bf16.msra.mxu1 %v678_v32 }
  0x3b   :  { %420 = vmatpush1.bf16.msra.mxu0 %v652_v26  ;;  %603 = vmatprep.subr.bf16.mxu1 %v681_v33 }
  0x3c   :  { %421 = vmatprep.subr.bf16.mxu0 %v654_v27 }
  0x3e   :  { %604 = vmatpush3.bf16.msra.mxu1 %v683_v37 }
  0x3f   :  { %422 = vmatpush2.bf16.msra.mxu0 %v657_v30 }
  0x40   :  { %423 = vmatprep.subr.bf16.mxu0 %v659_v31 }
  0x41   :  { %491 = vmatmul.mubr.bf16.vlgmr.msra.gmra.mxu1 %v684_v40 }
  0x42   :  { %498 = vmatprep.mubr.bf16.mxu1 %v693_v41 }
  0x43   :  { %424 = vmatpush2.bf16.msra.mxu0 %v662_v34 }
  0x44   :  { %425 = vmatprep.subr.bf16.mxu0 %v664_v36 }
  0x47   :  { %426 = vmatpush2.bf16.msra.mxu0 %v667_v38 }
  0x48   :  { %427 = vmatprep.subr.bf16.mxu0 %v669_v39 }
  0x49   :  { %499 = vmatmul.mubr.bf16.gmra.mxu1 %v695_v46 }
  0x4b   :  { %428 = vmatpush2.bf16.msra.mxu0 %v672_v42 }
  0x4c   :  { %429 = vmatprep.subr.bf16.mxu0 %v674_v43 }
  0x4f   :  { %430 = vmatpush2.bf16.msra.mxu0 %v677_v44 }
  0x50   :  { %431 = vmatprep.subr.bf16.mxu0 %v679_v45 }
  0x53   :  { %432 = vmatpush2.bf16.msra.mxu0 %v682_v47 }
  0x54   :  { %433 = vmatprep.subr.bf16.mxu0 %v687_v48 }
  0x57   :  { %434 = vmatpush2.bf16.msra.mxu0 %v689_v49 }
  0x58   :  { %435 = vmatprep.subr.bf16.mxu0 %v690_v50 }
  0x5b   :  { %436 = vmatpush2.bf16.msra.mxu0 %v692_v51 }
  0x5e   :  { %438 = vmatmul.mubr.bf16.vlgmr.msra.gmra.mxu0 %v684_v40 }
  0x5f   :  { %447 = vmatprep.mubr.bf16.mxu0 %v693_v41 }
  0x66   :  { %448 = vmatmul.mubr.bf16.gmra.mxu0 %v695_v46 }
 0x101   :  { %v605_v56 = vpop.f32.mrf.mxu1 }
 0x103   :  { %v606_v58 = vpop.f32.mrf.mxu1 }
 0x104   :  { %v607_v59 = vadd.f32 %v606_v58, %v605_v56 }
 0x105   :  { %v608_v60 = vpop.f32.mrf.mxu1 }
 0x106   :  { %v493_v61 = vadd.f32 %v607_v59, %v125_v57 }
 0x107   :  { %v609_v62 = vpop.f32.mrf.mxu1 }
 0x108   :  { %509 = vst [vmem:[#allocation7 + $0x10] sm:$0xff] %v493_v61  ;;  %v610_v63 = vadd.f32 %v609_v62, %v608_v60 }
 0x109   :  { %v611_v0 = vpop.f32.mrf.mxu1 }
 0x10a   :  { %v496_v1 = vadd.f32 %v610_v63, %v125_v57 }
 0x10b   :  { %v612_v2 = vpop.f32.mrf.mxu1 }
 0x10c   :  { %512 = vst [vmem:[#allocation7 + $0x28] sm:$0xff] %v496_v1  ;;  %v613_v3 = vadd.f32 %v612_v2, %v611_v0 }
 0x10d   :  { %v614_v4 = vpop.f32.mrf.mxu1 }
 0x10e   :  { %v501_v5 = vadd.f32 %v613_v3, %v125_v57 }
 0x10f   :  { %v615_v6 = vpop.f32.mrf.mxu1 }
 0x110   :  { %515 = vst [vmem:[#allocation7 + $0x40] sm:$0xff] %v501_v5  ;;  %v616_v8 = vadd.f32 %v615_v6, %v614_v4 }
 0x112   :  { %v504_v10 = vadd.f32 %v616_v8, %v125_v57 }
 0x114   :  { %518 = vst [vmem:[#allocation7 + $0x58] sm:$0xff] %v504_v10 }
 0x11e   :  { %v439_v13 = vpop.f32.mrf.mxu0 }
 0x11f   :  { %v440_v14 = vadd.f32 %v439_v13, %v117_v11 }
 0x120   :  { %v441_v15 = vpop.f32.mrf.mxu0 }
 0x121   :  { %507 = vst [vmem:[#allocation7] sm:$0xff] %v440_v14  ;;  %v442_v16 = vadd.f32 %v441_v15, %v121_v12 }
 0x122   :  { %v443_v17 = vpop.f32.mrf.mxu0 }
 0x123   :  { %508 = vst [vmem:[#allocation7 + $0x8] sm:$0xff] %v442_v16  ;;  %v444_v18 = vadd.f32 %v443_v17, %v117_v11 }
 0x124   :  { %v445_v19 = vpop.f32.mrf.mxu0 }
 0x125   :  { %510 = vst [vmem:[#allocation7 + $0x18] sm:$0xff] %v444_v18  ;;  %v446_v20 = vadd.f32 %v445_v19, %v121_v12 }
 0x126   :  { %v449_v21 = vpop.f32.mrf.mxu0 }
 0x127   :  { %511 = vst [vmem:[#allocation7 + $0x20] sm:$0xff] %v446_v20  ;;  %v450_v22 = vadd.f32 %v449_v21, %v117_v11 }
 0x128   :  { %v451_v23 = vpop.f32.mrf.mxu0 }
 0x129   :  { %513 = vst [vmem:[#allocation7 + $0x30] sm:$0xff] %v450_v22  ;;  %v452_v24 = vadd.f32 %v451_v23, %v121_v12 }
 0x12a   :  { %v453_v25 = vpop.f32.mrf.mxu0 }
 0x12b   :  { %514 = vst [vmem:[#allocation7 + $0x38] sm:$0xff] %v452_v24  ;;  %v454_v26 = vadd.f32 %v453_v25, %v117_v11 }
 0x12c   :  { %v455_v27 = vpop.f32.mrf.mxu0 }
 0x12d   :  { %516 = vst [vmem:[#allocation7 + $0x48] sm:$0xff] %v454_v26  ;;  %v456_v28 = vadd.f32 %v455_v27, %v121_v12 }
 0x12f   :  { %517 = vst [vmem:[#allocation7 + $0x50] sm:$0xff] %v456_v28 }
 0x130   :  { %747 = shalt.err (!%p744_p0)
}
 0x131   :  { %s769_s28 = smov 384   ;;  %s770_s29 = smov 24  }
 0x132   :  { %530 = dma.vmem_to_hbm [thread:$0]  %s525_s26, 1536, %s806_s3, [#allocation4], %s769_s28, %s769_s28, %s770_s29  }
 0x133   :  { %760 = dma.done.wait [#allocation4], 1536  }
 0x134   :  { %761 = vsyncadd [#allocation4], 4294965760 }
 0x135   :  { %534 = vsyncpa [#allocation3], 1 }
 0x136   :  { %535 = vsyncpa [#allocation6], 1 }
 0x137   :  { %536 = vsyncpa [#allocation4], 1 }

</bundles_post_ra>
